<compile_context>
chip_gen: v6e
topology: v6e:2x2x1
jax: 0.10.0
libtpu: 0.0.40
codegen_flags: <defaults>
</compile_context>

<pallas_src>
import math
import numpy as np
import jax
import jax.numpy as jnp
from jax import lax
from jax.experimental import pallas as pl
from jax.experimental.pallas import tpu as pltpu


def _make_kernel(n_interior, has_mid, block_b, n_per_jet):
    """n_interior: # of offsets with weight 2 (k = 1 .. (N-1)//2).
    has_mid: True iff N even (offset N/2, weight 1).
    Rows are position-major within the block: row = i*block_b + b."""

    def kernel(x_ref, wu_ref, wu1_ref, bu1_ref, we_ref, beh_ref, sel_ref, o_ref):
        # x_ref: (M, Dp) with M = block_b * N; ones column folded for fc_u bias.
        x = x_ref[...]

        # fc_u + relu (bias already folded into wu_ref via the ones column).
        u = jnp.maximum(
            jnp.dot(x, wu_ref[...], preferred_element_type=jnp.float32), 0.0)

        # fc_u1 + relu.
        u1 = jnp.maximum(
            jnp.dot(u, wu1_ref[...], preferred_element_type=jnp.float32)
            + bu1_ref[...], 0.0)

        # e_i = u1_i @ We^T + be/2   so   e_i + e_j = fc_edge(u1_i + u1_j).
        e = (jnp.dot(u1, we_ref[...], preferred_element_type=jnp.float32)
             + beh_ref[...])                                    # (M, H)

        # Offset k = 0 (diagonal pairs), weight 1.
        acc = jnp.tanh(e + e)

        # Interior offsets k = 1 .. (N-1)//2, weight 2 applied once at the end.
        # Per-jet circular shift == global sublane rotate by k*block_b (XLU).
        if n_interior > 0:
            if n_interior <= 16:
                acc_int = jnp.zeros_like(e)
                for k in range(1, n_interior + 1):
                    paired = pltpu.roll(e, shift=k * block_b, axis=0)
                    acc_int = acc_int + jnp.tanh(e + paired)
            else:
                def body(k, a):
                    paired = pltpu.roll(e, shift=k * block_b, axis=0)
                    return a + jnp.tanh(e + paired)
                acc_int = lax.fori_loop(1, n_interior + 1, body,
                                        jnp.zeros_like(e))
            acc = acc + 2.0 * acc_int

        # N even: offset N/2 pairs with itself under reversal -> weight 1.
        if has_mid:
            paired = pltpu.roll(e, shift=(n_per_jet // 2) * block_b, axis=0)
            acc = acc + jnp.tanh(e + paired)

        # Per-jet mean over the N*N ordered pairs as a small selector matmul
        # (MXU is idle now); writes a dense (block_b, H) output tile.
        o_ref[...] = jnp.dot(sel_ref[...], acc,
                             preferred_element_type=jnp.float32)

    return kernel


def relnn_transform_connected(jets_padded, params, block_b=None,
                              target_rows=2048):
    """jets_padded: (B, N, features+1) float32. Returns (B, hidden)."""
    wu, bu, wu1, bu1, we, be = params
    B, N, Din = jets_padded.shape
    H = wu.shape[0]

    # One large batch block by default (single-TC chips: grid splits are pure
    # overhead).  target_rows keeps the MXU M-dim well fed while staying far
    # below VMEM limits (working set is a handful of (M, H) f32 tiles).
    if block_b is None:
        block_b = max(1, min(B, target_rows // max(N, 1)))
    n_blocks = -(-B // block_b)
    if n_blocks > 1 and block_b % 8 != 0:
        # (8,128) rule: non-full second-minor block dims must be multiples of 8.
        block_b = ((block_b + 7) // 8) * 8
        n_blocks = -(-B // block_b)
    Bp = n_blocks * block_b
    M = block_b * N

    # Fold fc_u bias: ones column in x, bias row in Wu^T; pad K-dim to >= 8.
    Dp = max(8, ((Din + 1 + 7) // 8) * 8)
    x = jnp.concatenate(
        [jets_padded, jnp.ones((B, N, 1), jets_padded.dtype)], axis=-1)
    x = jnp.pad(x, ((0, Bp - B), (0, 0), (0, Dp - (Din + 1))))
    # Position-major / jet-minor row order within each batch block:
    # row = i*block_b + b, so per-jet shifts become global sublane rotates.
    x = x.reshape(n_blocks, block_b, N, Dp)
    x = jnp.transpose(x, (0, 2, 1, 3)).reshape(n_blocks * M, Dp)

    wu_t = jnp.pad(jnp.concatenate([wu.T, bu[None, :]], axis=0),
                   ((0, Dp - (Din + 1)), (0, 0)))   # (Dp, H), bias folded in
    wu1_t = wu1.T                                   # (H, H)
    we_t = we.T                                     # (H, H)
    bu1_r = bu1.reshape(1, H)
    be_half = (0.5 * be).reshape(1, H)

    # Per-jet mean selector: out[b] = (1/N^2) * sum_i acc[i*block_b + b].
    sel = np.zeros((block_b, M), np.float32)
    inv = 1.0 / (N * N)
    for b in range(block_b):
        sel[b, b::block_b] = inv
    sel = jnp.asarray(sel)

    n_interior = (N - 1) // 2
    has_mid = (N % 2 == 0) and N >= 2
    kernel = _make_kernel(n_interior, has_mid, block_b, N)

    const = dict(pipeline_mode=pl.Buffered(1))      # single-buffer constants

    out = pl.pallas_call(
        kernel,
        out_shape=jax.ShapeDtypeStruct((Bp, H), jnp.float32),
        grid_spec=pltpu.PrefetchScalarGridSpec(
            num_scalar_prefetch=0,
            grid=(n_blocks,),
            in_specs=[
                pl.BlockSpec((M, Dp), lambda blk: (blk, 0)),          # x rows
                pl.BlockSpec((Dp, H), lambda blk: (0, 0), **const),   # Wu^T+bias
                pl.BlockSpec((H, H), lambda blk: (0, 0), **const),    # Wu1^T
                pl.BlockSpec((1, H), lambda blk: (0, 0), **const),    # bu1
                pl.BlockSpec((H, H), lambda blk: (0, 0), **const),    # We^T
                pl.BlockSpec((1, H), lambda blk: (0, 0), **const),    # be / 2
                pl.BlockSpec((block_b, M), lambda blk: (0, 0), **const),  # sel
            ],
            out_specs=pl.BlockSpec((block_b, H), lambda blk: (blk, 0)),
        ),
        compiler_params=pltpu.CompilerParams(
            dimension_semantics=("parallel",),
        ),
    )(x, wu_t, wu1_t, bu1_r, we_t, be_half, sel)
    return out[:B]


def init_params(key, features, hidden):
    """Deterministic synthetic init mirroring the module's __init__ shapes."""
    din = features + 1
    gain = math.sqrt(2.0)  # calculate_gain('relu')
    k_wu, k_bu, k_wu1, k_bu1, k_we, k_be = jax.random.split(key, 6)

    # fc_u: xavier_uniform with gain
    bound = gain * math.sqrt(6.0 / (din + hidden))
    wu = jax.random.uniform(k_wu, (hidden, din), jnp.float32, -bound, bound)
    bu = jax.random.uniform(k_bu, (hidden,), jnp.float32,
                            -1.0 / math.sqrt(din), 1.0 / math.sqrt(din))

    # fc_u1, fc_edge: orthogonal with gain
    ortho = jax.nn.initializers.orthogonal(scale=gain)
    wu1 = ortho(k_wu1, (hidden, hidden), jnp.float32)
    bu1 = jax.random.uniform(k_bu1, (hidden,), jnp.float32,
                             -1.0 / math.sqrt(hidden), 1.0 / math.sqrt(hidden))
    we = ortho(k_we, (hidden, hidden), jnp.float32)
    be = jax.random.uniform(k_be, (hidden,), jnp.float32,
                            -1.0 / math.sqrt(hidden), 1.0 / math.sqrt(hidden))
    return wu, bu, wu1, bu1, we, be


def reference_forward(jets_padded, params):
    wu, bu, wu1, bu1, we, be = params
    x = jax.nn.relu(jnp.einsum("bnd,hd->bnh", jets_padded, wu) + bu)
    x = jax.nn.relu(jnp.einsum("bnh,gh->bng", x, wu1) + bu1)
    B, N, H = x.shape
    x_l = x[:, :, None, :]
    x_r = x[:, None, :, :]
    h = jnp.tanh(jnp.einsum("bijh,gh->bijg", x_l + x_r, we) + be)
    return h.reshape(B, N * N, H).mean(axis=1)


if __name__ == "__main__":
    features = 4       # -> input feature dim features+1 = 5
    hidden = 32
    B, N = 16, 8       # 16 (padded) jets, 8 leaves each -> one 128-row block

    key = jax.random.PRNGKey(0)
    k_x, k_p = jax.random.split(key)
    jets_padded = jax.random.normal(k_x, (B, N, features + 1), jnp.float32)
    params = init_params(k_p, features, hidden)

    out = relnn_transform_connected(jets_padded, params)
    out = jax.block_until_ready(out)

    ref = reference_forward(jets_padded, params)
    np.testing.assert_allclose(np.asarray(out), np.asarray(ref),
                               rtol=1e-5, atol=1e-5)

    # TODO(synk): the upstream `batch_leaves(jets)` ragged-padding step has no
    # Pallas equivalent; inputs here are assumed already padded to (B, N, F+1).
    print("KERNEL_OK")
</pallas_src>

<mosaic_0001>
module attributes {stable_mosaic.version = 11 : i64} {
  func.func @kernel(%arg0: i32, %arg1: memref<128x8xf32, #tpu.memory_space<vmem>>, %arg2: memref<8x32xf32, #tpu.memory_space<vmem>>, %arg3: memref<32x32xf32, #tpu.memory_space<vmem>>, %arg4: memref<1x32xf32, #tpu.memory_space<vmem>>, %arg5: memref<32x32xf32, #tpu.memory_space<vmem>>, %arg6: memref<1x32xf32, #tpu.memory_space<vmem>>, %arg7: memref<16x128xf32, #tpu.memory_space<vmem>>, %arg8: memref<16x32xf32, #tpu.memory_space<vmem>>) attributes {dimension_semantics = [#tpu.dimension_semantics<parallel>], iteration_bounds = array<i64: 1>, scalar_prefetch = 0 : i64, scratch_operands = 0 : i64, tpu.core_type = #tpu.core_type<tc>, window_params = [{transform_indices = @transform_0, window_bounds = array<i64: 128, 8>}, {pipeline_mode = #tpu.pipeline_mode<synchronous>, transform_indices = @transform_1, window_bounds = array<i64: 8, 32>}, {pipeline_mode = #tpu.pipeline_mode<synchronous>, transform_indices = @transform_2, window_bounds = array<i64: 32, 32>}, {pipeline_mode = #tpu.pipeline_mode<synchronous>, transform_indices = @transform_3, window_bounds = array<i64: 1, 32>}, {pipeline_mode = #tpu.pipeline_mode<synchronous>, transform_indices = @transform_4, window_bounds = array<i64: 32, 32>}, {pipeline_mode = #tpu.pipeline_mode<synchronous>, transform_indices = @transform_5, window_bounds = array<i64: 1, 32>}, {pipeline_mode = #tpu.pipeline_mode<synchronous>, transform_indices = @transform_6, window_bounds = array<i64: 16, 128>}, {transform_indices = @transform_7, window_bounds = array<i64: 16, 32>}]} {
    %c0 = arith.constant 0 : index
    %c0_0 = arith.constant 0 : index
    %0 = vector.load %arg1[%c0, %c0_0] : memref<128x8xf32, #tpu.memory_space<vmem>>, vector<128x8xf32>
    %c0_1 = arith.constant 0 : index
    %c0_2 = arith.constant 0 : index
    %1 = vector.load %arg2[%c0_1, %c0_2] : memref<8x32xf32, #tpu.memory_space<vmem>>, vector<8x32xf32>
    %cst = arith.constant dense<0.000000e+00> : vector<128x32xf32>
    %2 = tpu.matmul %0, %1, %cst {dimension_numbers = #tpu.dot_dimension_numbers<[1], [0], [0], [1], [0, 0, 1, 1], [], []>} : vector<128x8xf32>, vector<8x32xf32>, vector<128x32xf32> -> vector<128x32xf32>
    %cst_3 = arith.constant 0.000000e+00 : f32
    %3 = vector.broadcast %cst_3 : f32 to vector<128x32xf32>
    %4 = arith.maximumf %2, %3 : vector<128x32xf32>
    %c0_4 = arith.constant 0 : index
    %c0_5 = arith.constant 0 : index
    %5 = vector.load %arg3[%c0_4, %c0_5] : memref<32x32xf32, #tpu.memory_space<vmem>>, vector<32x32xf32>
    %cst_6 = arith.constant dense<0.000000e+00> : vector<128x32xf32>
    %6 = tpu.matmul %4, %5, %cst_6 {dimension_numbers = #tpu.dot_dimension_numbers<[1], [0], [0], [1], [0, 0, 1, 1], [], []>} : vector<128x32xf32>, vector<32x32xf32>, vector<128x32xf32> -> vector<128x32xf32>
    %c0_7 = arith.constant 0 : index
    %c0_8 = arith.constant 0 : index
    %7 = vector.load %arg4[%c0_7, %c0_8] : memref<1x32xf32, #tpu.memory_space<vmem>>, vector<1x32xf32>
    %8 = vector.broadcast %7 : vector<1x32xf32> to vector<128x32xf32>
    %9 = arith.addf %6, %8 : vector<128x32xf32>
    %cst_9 = arith.constant 0.000000e+00 : f32
    %10 = vector.broadcast %cst_9 : f32 to vector<128x32xf32>
    %11 = arith.maximumf %9, %10 : vector<128x32xf32>
    %c0_10 = arith.constant 0 : index
    %c0_11 = arith.constant 0 : index
    %12 = vector.load %arg5[%c0_10, %c0_11] : memref<32x32xf32, #tpu.memory_space<vmem>>, vector<32x32xf32>
    %cst_12 = arith.constant dense<0.000000e+00> : vector<128x32xf32>
    %13 = tpu.matmul %11, %12, %cst_12 {dimension_numbers = #tpu.dot_dimension_numbers<[1], [0], [0], [1], [0, 0, 1, 1], [], []>} : vector<128x32xf32>, vector<32x32xf32>, vector<128x32xf32> -> vector<128x32xf32>
    %c0_13 = arith.constant 0 : index
    %c0_14 = arith.constant 0 : index
    %14 = vector.load %arg6[%c0_13, %c0_14] : memref<1x32xf32, #tpu.memory_space<vmem>>, vector<1x32xf32>
    %15 = vector.broadcast %14 : vector<1x32xf32> to vector<128x32xf32>
    %16 = arith.addf %13, %15 : vector<128x32xf32>
    %17 = arith.addf %16, %16 : vector<128x32xf32>
    %18 = math.tanh %17 : vector<128x32xf32>
    %cst_15 = arith.constant 0.000000e+00 : f32
    %19 = vector.broadcast %cst_15 : f32 to vector<128x32xf32>
    %c16_i32 = arith.constant 16 : i32
    %20 = tpu.dynamic_rotate %16 by %c16_i32 dim 0 : vector<128x32xf32>, i32 -> vector<128x32xf32>
    %21 = arith.addf %16, %20 : vector<128x32xf32>
    %22 = math.tanh %21 : vector<128x32xf32>
    %23 = arith.addf %19, %22 : vector<128x32xf32>
    %c32_i32 = arith.constant 32 : i32
    %24 = tpu.dynamic_rotate %16 by %c32_i32 dim 0 : vector<128x32xf32>, i32 -> vector<128x32xf32>
    %25 = arith.addf %16, %24 : vector<128x32xf32>
    %26 = math.tanh %25 : vector<128x32xf32>
    %27 = arith.addf %23, %26 : vector<128x32xf32>
    %c48_i32 = arith.constant 48 : i32
    %28 = tpu.dynamic_rotate %16 by %c48_i32 dim 0 : vector<128x32xf32>, i32 -> vector<128x32xf32>
    %29 = arith.addf %16, %28 : vector<128x32xf32>
    %30 = math.tanh %29 : vector<128x32xf32>
    %31 = arith.addf %27, %30 : vector<128x32xf32>
    %cst_16 = arith.constant 2.000000e+00 : f32
    %32 = vector.broadcast %cst_16 : f32 to vector<128x32xf32>
    %33 = arith.mulf %32, %31 : vector<128x32xf32>
    %34 = arith.addf %18, %33 : vector<128x32xf32>
    %c64_i32 = arith.constant 64 : i32
    %35 = tpu.dynamic_rotate %16 by %c64_i32 dim 0 : vector<128x32xf32>, i32 -> vector<128x32xf32>
    %36 = arith.addf %16, %35 : vector<128x32xf32>
    %37 = math.tanh %36 : vector<128x32xf32>
    %38 = arith.addf %34, %37 : vector<128x32xf32>
    %c0_17 = arith.constant 0 : index
    %c0_18 = arith.constant 0 : index
    %39 = vector.load %arg7[%c0_17, %c0_18] : memref<16x128xf32, #tpu.memory_space<vmem>>, vector<16x128xf32>
    %cst_19 = arith.constant dense<0.000000e+00> : vector<16x32xf32>
    %40 = tpu.matmul %39, %38, %cst_19 {dimension_numbers = #tpu.dot_dimension_numbers<[1], [0], [0], [1], [0, 0, 1, 1], [], []>} : vector<16x128xf32>, vector<128x32xf32>, vector<16x32xf32> -> vector<16x32xf32>
    %c0_20 = arith.constant 0 : index
    %c0_21 = arith.constant 0 : index
    %41 = vector.load %arg8[%c0_20, %c0_21] : memref<16x32xf32, #tpu.memory_space<vmem>>, vector<16x32xf32>
    tpu.vector_store %arg8[%c0_20, %c0_21], %40 {strides = array<i32>} : memref<16x32xf32, #tpu.memory_space<vmem>>, vector<16x32xf32>,
    return
  }
  func.func @transform_0(%arg0: i32) -> (i32, i32) {
    %c0_i32 = arith.constant 0 : i32
    %c0_i32_0 = arith.constant 0 : i32
    return %arg0, %c0_i32 : i32, i32
  }
  func.func @transform_1(%arg0: i32) -> (i32, i32) {
    %c0_i32 = arith.constant 0 : i32
    %c0_i32_0 = arith.constant 0 : i32
    %c0_i32_1 = arith.constant 0 : i32
    return %c0_i32, %c0_i32_0 : i32, i32
  }
  func.func @transform_2(%arg0: i32) -> (i32, i32) {
    %c0_i32 = arith.constant 0 : i32
    %c0_i32_0 = arith.constant 0 : i32
    %c0_i32_1 = arith.constant 0 : i32
    return %c0_i32, %c0_i32_0 : i32, i32
  }
  func.func @transform_3(%arg0: i32) -> (i32, i32) {
    %c0_i32 = arith.constant 0 : i32
    %c0_i32_0 = arith.constant 0 : i32
    %c0_i32_1 = arith.constant 0 : i32
    return %c0_i32, %c0_i32_0 : i32, i32
  }
  func.func @transform_4(%arg0: i32) -> (i32, i32) {
    %c0_i32 = arith.constant 0 : i32
    %c0_i32_0 = arith.constant 0 : i32
    %c0_i32_1 = arith.constant 0 : i32
    return %c0_i32, %c0_i32_0 : i32, i32
  }
  func.func @transform_5(%arg0: i32) -> (i32, i32) {
    %c0_i32 = arith.constant 0 : i32
    %c0_i32_0 = arith.constant 0 : i32
    %c0_i32_1 = arith.constant 0 : i32
    return %c0_i32, %c0_i32_0 : i32, i32
  }
  func.func @transform_6(%arg0: i32) -> (i32, i32) {
    %c0_i32 = arith.constant 0 : i32
    %c0_i32_0 = arith.constant 0 : i32
    %c0_i32_1 = arith.constant 0 : i32
    return %c0_i32, %c0_i32_0 : i32, i32
  }
  func.func @transform_7(%arg0: i32) -> (i32, i32) {
    %c0_i32 = arith.constant 0 : i32
    %c0_i32_0 = arith.constant 0 : i32
    return %arg0, %c0_i32 : i32, i32
  }
}

</mosaic_0001>

<bundles_post_ra>
// kernel: tpu_custom_call.1
= control target key start
LH: loop header
LB: loop body
LE: loop exit
PB: predicated region body
PF: predicated region fallthrough
CT: control target
= control target key end

     0   :  { %vm44_vm0 = vcmask 64512   ;;  %s1901_s0 = inlined_call_operand.vmem [shape: f32[128,8], index: 0, kind: input, shape index: {}]   ;;  %s1902_s1 = inlined_call_operand.vmem [shape: f32[8,32], index: 1, kind: input, shape index: {}]   ;;  %s1903_s2 = inlined_call_operand.vmem [shape: f32[32,32], index: 2, kind: input, shape index: {}]   ;;  %s1904_s3 = inlined_call_operand.vmem [shape: f32[1,32], index: 3, kind: input, shape index: {}]   ;;  %s1905_s4 = inlined_call_operand.vmem [shape: f32[32,32], index: 4, kind: input, shape index: {}]   ;;  %s1906_s5 = inlined_call_operand.vmem [shape: f32[1,32], index: 5, kind: input, shape index: {}]   ;;  %s1907_s6 = inlined_call_operand.vmem [shape: f32[16,128], index: 6, kind: input, shape index: {}]   ;;  %s1908_s7 = inlined_call_operand.hbm [shape: f32[16,32], index: 7, kind: output, shape index: {}]  }
   0x1   :  { %v43_v0 = vld [vmem:[%s1902_s1] sm:$0xff]  ;;  %v28_v2 = vld [vmem:[%s1901_s0 + $0x8] sm:$0xff]  ;;  %v29_v3 = vld [vmem:[%s1901_s0 + $0x10] sm:$0xff] }
   0x2   :  { %v27_v1 = vld [vmem:[%s1901_s0] sm:$0xff]  ;;  %1139 = vmatprep.subr.mxu0 %v43_v0  ;;  %1264 = vmatprep.subr.mxu1 %v43_v0  ;;  %v37_v4 = vld [vmem:[%s1901_s0 + $0x50] sm:$0xff]  ;;  %v30_v5 = vld [vmem:[%s1901_s0 + $0x18] sm:$0xff] }
   0x3   :  { %1141 = vmatprep.mubr.msk.f32.mxu0 %vm44_vm0, %v27_v1  ;;  %1140 = vmatpush3.msra.mxu0 %v43_v0  ;;  %v38_v6 = vld [vmem:[%s1901_s0 + $0x58] sm:$0xff]  ;;  %v39_v7 = vld [vmem:[%s1901_s0 + $0x60] sm:$0xff]  ;;  %v40_v10 = vld [vmem:[%s1901_s0 + $0x68] sm:$0xff] }
   0x4   :  { %1142 = vmatmul.mubr.msk.f32.vlgmr.msra.gmra.mxu0 %vm44_vm0, %v28_v2  ;;  %1265 = vmatpush3.msra.mxu1 %v43_v0  ;;  %v31_v8 = vld [vmem:[%s1901_s0 + $0x20] sm:$0xff]  ;;  %v257_v9 = vld [vmem:[%s1903_s2 + $0x18] sm:$0xff]  ;;  %v256_v11 = vld [vmem:[%s1903_s2 + $0x10] sm:$0xff] }
   0x5   :  { %1144 = vmatprep.mubr.msk.f32.mxu0 %vm44_vm0, %v29_v3  ;;  %1156 = vmatprep.mubr.msk.f32.mxu1 %vm44_vm0, %v37_v4 }
   0x6   :  { %1157 = vmatmul.mubr.msk.f32.vlgmr.msra.gmra.mxu1 %vm44_vm0, %v38_v6  ;;  %1165 = vmatprep.subr.mxu1 %v257_v9 }
   0x7   :  { %1159 = vmatprep.mubr.msk.f32.mxu1 %vm44_vm0, %v39_v7 }
   0x8   :  { %12 = vsyncpa [#allocation3], 0  ;;  %1145 = vmatmul.mubr.msk.f32.gmra.mxu0 %vm44_vm0, %v30_v5  ;;  %v41_v12 = vld [vmem:[%s1901_s0 + $0x70] sm:$0xff]  ;;  %1166 = vmatpush3.msra.mxu1 %v257_v9  ;;  %v32_v13 = vld [vmem:[%s1901_s0 + $0x28] sm:$0xff]  ;;  %vm265_vm1 = vcmask 261120   ;;  %s1435_s29 = smov [#allocation2]  }
   0x9   :  { %1147 = vmatprep.mubr.msk.f32.mxu0 %vm44_vm0, %v31_v8  ;;  %1167 = vmatprep.subr.mxu1 %v256_v11  ;;  %v33_v14 = vld [vmem:[%s1901_s0 + $0x30] sm:$0xff]  ;;  %v42_v15 = vld [vmem:[%s1901_s0 + $0x78] sm:$0xff]  ;;  %v35_v17 = vld [vmem:[%s1901_s0 + $0x40] sm:$0xff]  ;;  %s1003_s30 = sshll.u32 %s1435_s29, 4  ;;  %s1004_s30 = int_to_ptr.vmem [resolvable:$true] %s1003_s30 }
   0xa   :  { %1160 = vmatmul.mubr.msk.f32.gmra.mxu1 %vm44_vm0, %v40_v10  ;;  %v34_v16 = vld [vmem:[%s1901_s0 + $0x38] sm:$0xff]  ;;  %v36_v18 = vld [vmem:[%s1901_s0 + $0x48] sm:$0xff]  ;;  %v254_v20 = vld [vmem:[%s1903_s2] sm:$0xff]  ;;  %s1413_s8 = scalar_lea.vmem %s1004_s30, 256  ;;  %p1418_p1 = scmp.lt.s32.totalorder %s1004_s30, %s1004_s30 }
   0xb   :  { %1162 = vmatprep.mubr.msk.f32.mxu1 %vm44_vm0, %v41_v12  ;;  %1168 = vmatpush3.msra.mxu1 %v256_v11  ;;  %v255_v19 = vld [vmem:[%s1903_s2 + $0x8] sm:$0xff]  ;;  %v478_v21 = vld [vmem:[%s1905_s4 + $0x18] sm:$0xff]  ;;  %v477_v22 = vld [vmem:[%s1905_s4 + $0x10] sm:$0xff]  ;;  %p1414_p0 = scmp.ne.s32.totalorder %s1004_s30, %s1413_s8  ;;  %p1419_p2 = scmp.lt.s32.totalorder %s1413_s8, %s1413_s8 }
   0xc   :  { %1148 = vmatmul.mubr.msk.f32.gmra.mxu0 %vm44_vm0, %v32_v13  ;;  %1169 = vmatprep.subr.mxu1 %v255_v19  ;;  %v476_v23 = vld [vmem:[%s1905_s4 + $0x8] sm:$0xff]  ;;  %v475_v56 = vld [vmem:[%s1905_s4] sm:$0xff] }
   0xd   :  { %1150 = vmatprep.mubr.msk.f32.mxu0 %vm44_vm0, %v33_v14  ;;  %1170 = vmatpush3.msra.mxu1 %v255_v19  ;;  %v1030_v57 = vld [vmem:[%s1904_s3] ss:$0 sm:$0xff]  ;;  %p1420_p3 = por %p1419_p2, %p1418_p1 }
   0xe   :  { %1163 = vmatmul.mubr.msk.f32.gmra.mxu1 %vm44_vm0, %v42_v15  ;;  %1171 = vmatprep.subr.mxu1 %v254_v20 }
   0xf   :  { %1172 = vmatpush3.msra.mxu1 %v254_v20  ;;  %1197 = vmatprep.subr.mxu0 %v478_v21  ;;  %p1421_p4 = pnand %p1420_p3, %p1414_p0 }
  0x10   :  { %1151 = vmatmul.mubr.msk.f32.gmra.mxu0 %vm44_vm0, %v34_v16 }
  0x11   :  { %1153 = vmatprep.mubr.msk.f32.mxu0 %vm44_vm0, %v35_v17  ;;  %1198 = vmatpush3.msra.mxu0 %v478_v21 }
  0x12   :  { %1199 = vmatprep.subr.mxu0 %v477_v22 }
  0x13   :  { %1200 = vmatpush3.msra.mxu0 %v477_v22 }
  0x14   :  { %1154 = vmatmul.mubr.msk.f32.gmra.mxu0 %vm44_vm0, %v36_v18  ;;  %1201 = vmatprep.subr.mxu0 %v476_v23 }
  0x15   :  { %1202 = vmatpush3.msra.mxu0 %v476_v23 }
  0x16   :  { %1203 = vmatprep.subr.mxu0 %v475_v56 }
  0x17   :  { %1204 = vmatpush3.msra.mxu0 %v475_v56 }
  0xc4   :  { %v1143_v24 = vpop.f32.mrf.mxu0 }
  0xc5   :  { %v239_v27 = vmax.f32 %v1143_v24, 0.0 }
  0xc6   :  { %v159_v25 = vpop.f32.mrf.mxu0  ;;  %v1158_v29 = vpop.f32.mrf.mxu1 }
  0xc7   :  { %v238_v26 = vmax.f32 %v159_v25, 0.0  ;;  %v249_v51 = vmax.f32 %v1158_v29, 0.0 }
  0xc8   :  { %v1146_v28 = vpop.f32.mrf.mxu0  ;;  %v209_v34 = vpop.f32.mrf.mxu1 }
  0xc9   :  { %1173 = vmatprep.mubr.msk.f32.mxu1 %vm265_vm1, %v238_v26  ;;  %v241_v32 = vmax.f32 %v1146_v28, 0.0  ;;  %v248_v47 = vmax.f32 %v209_v34, 0.0 }
  0xca   :  { %v169_v30 = vpop.f32.mrf.mxu0  ;;  %1174 = vmatmul.mubr.msk.f32.vlgmr.msra.gmra.mxu1 %vm265_vm1, %v239_v27  ;;  %v1161_v39 = vpop.f32.mrf.mxu1 }
  0xcb   :  { %v240_v31 = vmax.f32 %v169_v30, 0.0  ;;  %v251_v54 = vmax.f32 %v1161_v39, 0.0 }
  0xcc   :  { %v1149_v33 = vpop.f32.mrf.mxu0  ;;  %v219_v44 = vpop.f32.mrf.mxu1 }
  0xcd   :  { %1176 = vmatprep.mubr.msk.f32.mxu1 %vm265_vm1, %v240_v31  ;;  %v243_v37 = vmax.f32 %v1149_v33, 0.0  ;;  %v250_v50 = vmax.f32 %v219_v44, 0.0 }
  0xce   :  { %v179_v35 = vpop.f32.mrf.mxu0  ;;  %1177 = vmatmul.mubr.msk.f32.gmra.mxu1 %vm265_vm1, %v241_v32  ;;  %v1164_v49 = vpop.f32.mrf.mxu1 }
  0xcf   :  { %v242_v36 = vmax.f32 %v179_v35, 0.0  ;;  %v253_v55 = vmax.f32 %v1164_v49, 0.0 }
  0xd0   :  { %v1152_v38 = vpop.f32.mrf.mxu0  ;;  %v229_v52 = vpop.f32.mrf.mxu1 }
  0xd1   :  { %1179 = vmatprep.mubr.msk.f32.mxu1 %vm265_vm1, %v242_v36  ;;  %v245_v42 = vmax.f32 %v1152_v38, 0.0  ;;  %v252_v53 = vmax.f32 %v229_v52, 0.0 }
  0xd2   :  { %v189_v40 = vpop.f32.mrf.mxu0  ;;  %1180 = vmatmul.mubr.msk.f32.gmra.mxu1 %vm265_vm1, %v243_v37 }
  0xd3   :  { %v244_v41 = vmax.f32 %v189_v40, 0.0 }
  0xd4   :  { %v1155_v43 = vpop.f32.mrf.mxu0 }
  0xd5   :  { %1182 = vmatprep.mubr.msk.f32.mxu1 %vm265_vm1, %v244_v41  ;;  %v247_v48 = vmax.f32 %v1155_v43, 0.0 }
  0xd6   :  { %v199_v45 = vpop.f32.mrf.mxu0  ;;  %1183 = vmatmul.mubr.msk.f32.gmra.mxu1 %vm265_vm1, %v245_v42  ;;  %v919_v42 = vld [vmem:[%s1907_s6] sm:$0xff] }
  0xd7   :  { %v246_v46 = vmax.f32 %v199_v45, 0.0 }
  0xd9   :  { %1185 = vmatprep.mubr.msk.f32.mxu1 %vm265_vm1, %v246_v46  ;;  %v1612_v46 = vld [vmem:[%s1906_s5] ss:$0 sm:$0xff] }
  0xda   :  { %1186 = vmatmul.mubr.msk.f32.gmra.mxu1 %vm265_vm1, %v247_v48 }
  0xdb   :  { %1188 = vmatprep.mubr.msk.f32.mxu1 %vm265_vm1, %v248_v47 }
  0xde   :  { %1189 = vmatmul.mubr.msk.f32.gmra.mxu1 %vm265_vm1, %v249_v51 }
  0xdf   :  { %1191 = vmatprep.mubr.msk.f32.mxu1 %vm265_vm1, %v250_v50 }
  0xe2   :  { %1192 = vmatmul.mubr.msk.f32.gmra.mxu1 %vm265_vm1, %v251_v54 }
  0xe3   :  { %1194 = vmatprep.mubr.msk.f32.mxu1 %vm265_vm1, %v252_v53 }
  0xe6   :  { %1195 = vmatmul.mubr.msk.f32.gmra.mxu1 %vm265_vm1, %v253_v55 }
  0xe7   :  { %1261 = vmatprep.mubr.f32.mxu1 %v919_v42 }
 0x18a   :  { %v1175_v58 = vpop.f32.mrf.mxu1 }
 0x18b   :  { %v386_v59 = vadd.f32 %v1175_v58, %v1030_v57 }
 0x18c   :  { %v380_v60 = vpop.f32.mrf.mxu1 }
 0x18d   :  { %v381_v61 = vadd.f32 %v1030_v57, %v380_v60  ;;  %v460_v0 = vmax.f32 %v386_v59, 0.0 }
 0x18e   :  { %v1178_v62 = vpop.f32.mrf.mxu1 }
 0x18f   :  { %v459_v63 = vmax.f32 %v381_v61, 0.0  ;;  %v396_v1 = vadd.f32 %v1178_v62, %v1030_v57 }
 0x190   :  { %v390_v2 = vpop.f32.mrf.mxu1 }
 0x191   :  { %v391_v3 = vadd.f32 %v1030_v57, %v390_v2  ;;  %1205 = vmatprep.mubr.msk.f32.mxu0 %vm265_vm1, %v459_v63  ;;  %v462_v6 = vmax.f32 %v396_v1, 0.0 }
 0x192   :  { %v1181_v4 = vpop.f32.mrf.mxu1  ;;  %1206 = vmatmul.mubr.msk.f32.vlgmr.msra.gmra.mxu0 %vm265_vm1, %v460_v0 }
 0x193   :  { %v461_v5 = vmax.f32 %v391_v3, 0.0  ;;  %v406_v7 = vadd.f32 %v1181_v4, %v1030_v57 }
 0x194   :  { %v400_v8 = vpop.f32.mrf.mxu1 }
 0x195   :  { %v401_v9 = vadd.f32 %v1030_v57, %v400_v8  ;;  %1208 = vmatprep.mubr.msk.f32.mxu0 %vm265_vm1, %v461_v5  ;;  %v464_v12 = vmax.f32 %v406_v7, 0.0 }
 0x196   :  { %v1184_v10 = vpop.f32.mrf.mxu1  ;;  %1209 = vmatmul.mubr.msk.f32.gmra.mxu0 %vm265_vm1, %v462_v6 }
 0x197   :  { %v463_v11 = vmax.f32 %v401_v9, 0.0  ;;  %v416_v13 = vadd.f32 %v1184_v10, %v1030_v57 }
 0x198   :  { %v410_v14 = vpop.f32.mrf.mxu1 }
 0x199   :  { %v411_v15 = vadd.f32 %v1030_v57, %v410_v14  ;;  %1211 = vmatprep.mubr.msk.f32.mxu0 %vm265_vm1, %v463_v11  ;;  %v466_v18 = vmax.f32 %v416_v13, 0.0 }
 0x19a   :  { %v1187_v16 = vpop.f32.mrf.mxu1  ;;  %1212 = vmatmul.mubr.msk.f32.gmra.mxu0 %vm265_vm1, %v464_v12 }
 0x19b   :  { %v465_v17 = vmax.f32 %v411_v15, 0.0  ;;  %v426_v19 = vadd.f32 %v1187_v16, %v1030_v57 }
 0x19c   :  { %v420_v20 = vpop.f32.mrf.mxu1 }
 0x19d   :  { %v421_v21 = vadd.f32 %v1030_v57, %v420_v20  ;;  %1214 = vmatprep.mubr.msk.f32.mxu0 %vm265_vm1, %v465_v17  ;;  %v468_v24 = vmax.f32 %v426_v19, 0.0 }
 0x19e   :  { %v1190_v22 = vpop.f32.mrf.mxu1  ;;  %1215 = vmatmul.mubr.msk.f32.gmra.mxu0 %vm265_vm1, %v466_v18 }
 0x19f   :  { %v467_v23 = vmax.f32 %v421_v21, 0.0  ;;  %v436_v25 = vadd.f32 %v1190_v22, %v1030_v57 }
 0x1a0   :  { %v430_v26 = vpop.f32.mrf.mxu1 }
 0x1a1   :  { %v431_v27 = vadd.f32 %v1030_v57, %v430_v26  ;;  %1217 = vmatprep.mubr.msk.f32.mxu0 %vm265_vm1, %v467_v23  ;;  %v470_v30 = vmax.f32 %v436_v25, 0.0 }
 0x1a2   :  { %v1193_v28 = vpop.f32.mrf.mxu1  ;;  %1218 = vmatmul.mubr.msk.f32.gmra.mxu0 %vm265_vm1, %v468_v24 }
 0x1a3   :  { %v469_v29 = vmax.f32 %v431_v27, 0.0  ;;  %v446_v31 = vadd.f32 %v1193_v28, %v1030_v57 }
 0x1a4   :  { %v440_v32 = vpop.f32.mrf.mxu1 }
 0x1a5   :  { %v441_v33 = vadd.f32 %v1030_v57, %v440_v32  ;;  %1220 = vmatprep.mubr.msk.f32.mxu0 %vm265_vm1, %v469_v29  ;;  %v472_v36 = vmax.f32 %v446_v31, 0.0 }
 0x1a6   :  { %v1196_v34 = vpop.f32.mrf.mxu1  ;;  %1221 = vmatmul.mubr.msk.f32.gmra.mxu0 %vm265_vm1, %v470_v30 }
 0x1a7   :  { %v471_v35 = vmax.f32 %v441_v33, 0.0  ;;  %v456_v37 = vadd.f32 %v1196_v34, %v1030_v57 }
 0x1a8   :  { %v450_v38 = vpop.f32.mrf.mxu1 }
 0x1a9   :  { %v451_v39 = vadd.f32 %v1030_v57, %v450_v38  ;;  %1223 = vmatprep.mubr.msk.f32.mxu0 %vm265_vm1, %v471_v35  ;;  %v474_v41 = vmax.f32 %v456_v37, 0.0 }
 0x1aa   :  { %1224 = vmatmul.mubr.msk.f32.gmra.mxu0 %vm265_vm1, %v472_v36 }
 0x1ab   :  { %v473_v40 = vmax.f32 %v451_v39, 0.0 }
 0x1ad   :  { %1226 = vmatprep.mubr.msk.f32.mxu0 %vm265_vm1, %v473_v40 }
 0x1ae   :  { %1227 = vmatmul.mubr.msk.f32.gmra.mxu0 %vm265_vm1, %v474_v41 }
 0x252   :  { %v1207_v43 = vpop.f32.mrf.mxu0 }
 0x253   :  { %v1621_v51 = vadd.f32 %v1207_v43, %v1612_v46 }
 0x254   :  { %v1607_v44 = vpop.f32.mrf.mxu0 }
 0x256   :  { %v1210_v45 = vpop.f32.mrf.mxu0 }
 0x257   :  { %v1615_v47 = vadd.f32 %v1210_v45, %v1612_v46 }
 0x258   :  { %v610_v48 = vpop.f32.mrf.mxu0 }
 0x259   :  { %v1618_v49 = vadd.f32 %v1612_v46, %v610_v48  ;;  %v682_v54 = vadd.f32 %v1615_v47, %v1615_v47  ;;  %v714_v55 = vadd.f32 %v1615_v47, %v1621_v51 }
 0x25a   :  { %v1213_v50 = vpop.f32.mrf.mxu0 }
 0x25b   :  { %v1624_v52 = vadd.f32 %v1213_v50, %v1612_v46  ;;  %v681_v57 = vadd.f32 %v1618_v49, %v1618_v49  ;;  %1269 = vtanh.f32 %v682_v54 }
 0x25c   :  { %v1626_v53 = vpop.f32.mrf.mxu0  ;;  %1271 = vtanh.f32 %v714_v55 }
 0x25d   :  { %v684_v59 = vadd.f32 %v1624_v52, %v1624_v52  ;;  %v716_v61 = vadd.f32 %v1624_v52, %v1615_v47  ;;  %v764_v62 = vadd.f32 %v1624_v52, %v1621_v51  ;;  %1273 = vtanh.f32 %v681_v57 }
 0x25e   :  { %v1216_v56 = vpop.f32.mrf.mxu0 }
 0x25f   :  { %v1635_v58 = vadd.f32 %v1216_v56, %v1612_v46  ;;  %1275 = vtanh.f32 %v684_v59 }
 0x260   :  { %v1639_v60 = vpop.f32.mrf.mxu0  ;;  %1277 = vtanh.f32 %v716_v61 }
 0x261   :  { %v686_v0 = vadd.f32 %v1635_v58, %v1635_v58  ;;  %v718_v2 = vadd.f32 %v1635_v58, %v1624_v52  ;;  %v766_v4 = vadd.f32 %v1635_v58, %v1615_v47  ;;  %1279 = vtanh.f32 %v764_v62 }
 0x262   :  { %v1219_v63 = vpop.f32.mrf.mxu0  ;;  %v1729_v45 = vadd.f32 %v1612_v46, %v1639_v60 }
 0x263   :  { %v1648_v1 = vadd.f32 %v1219_v63, %v1612_v46  ;;  %1281 = vtanh.f32 %v686_v0 }
 0x264   :  { %v640_v3 = vpop.f32.mrf.mxu0  ;;  %1283 = vtanh.f32 %v718_v2 }
 0x265   :  { %v688_v5 = vadd.f32 %v1648_v1, %v1648_v1  ;;  %v720_v7 = vadd.f32 %v1648_v1, %v1635_v58  ;;  %v768_v9 = vadd.f32 %v1648_v1, %v1624_v52  ;;  %1285 = vtanh.f32 %v766_v4 }
 0x266   :  { %v1222_v6 = vpop.f32.mrf.mxu0  ;;  %v1721_v41 = vadd.f32 %v1612_v46, %v640_v3  ;;  %v1759_v4 = vadd.f32 %v1612_v46, %v1626_v53 }
 0x267   :  { %v1659_v8 = vadd.f32 %v1222_v6, %v1612_v46  ;;  %1287 = vtanh.f32 %v688_v5 }
 0x268   :  { %v650_v10 = vpop.f32.mrf.mxu0  ;;  %1289 = vtanh.f32 %v720_v7  ;;  %v1672_v17 = vpop.eup %1269 }
 0x269   :  { %v690_v11 = vadd.f32 %v1659_v8, %v1659_v8  ;;  %v722_v12 = vadd.f32 %v1659_v8, %v1648_v1  ;;  %v770_v14 = vadd.f32 %v1659_v8, %v1635_v58  ;;  %1291 = vtanh.f32 %v768_v9  ;;  %v1678_v20 = vpop.eup %1271 }
 0x26a   :  { %v1225_v13 = vpop.f32.mrf.mxu0  ;;  %v1682_v23 = vpop.eup %1273  ;;  %v1714_v38 = vadd.f32 %v1612_v46, %v650_v10 }
 0x26b   :  { %v1670_v15 = vadd.f32 %v1225_v13, %v1612_v46  ;;  %1293 = vtanh.f32 %v690_v11  ;;  %v818_v11 = vadd.f32 %v1659_v8, %v1624_v52 }
 0x26c   :  { %v660_v16 = vpop.f32.mrf.mxu0  ;;  %1295 = vtanh.f32 %v722_v12  ;;  %v1687_v25 = vpop.eup %1275  ;;  %v890_v12 = vadd.f32 %v1659_v8, %v1615_v47 }
 0x26d   :  { %v692_v18 = vadd.f32 %v1670_v15, %v1670_v15  ;;  %v724_v19 = vadd.f32 %v1670_v15, %v1659_v8  ;;  %v772_v22 = vadd.f32 %v1670_v15, %v1648_v1  ;;  %1297 = vtanh.f32 %v770_v14  ;;  %v1689_v27 = vpop.eup %1277 }
 0x26e   :  { %v1228_v21 = vpop.f32.mrf.mxu0  ;;  %v1700_v32 = vpop.eup %1279  ;;  %v1707_v35 = vadd.f32 %v1612_v46, %v660_v16  ;;  %v820_v59 = vadd.f32 %v1670_v15, %v1635_v58  ;;  %v892_v61 = vadd.f32 %v1670_v15, %v1624_v52  ;;  %v689_v14 = vadd.f32 %v1714_v38, %v1714_v38 }
 0x26f   :  { %v1685_v24 = vadd.f32 %v1228_v21, %v1612_v46  ;;  %1299 = vtanh.f32 %v692_v18 }
 0x270   :  { %v670_v26 = vpop.f32.mrf.mxu0  ;;  %1301 = vtanh.f32 %v724_v19  ;;  %v1704_v34 = vpop.eup %1281  ;;  %v691_v63 = vadd.f32 %v1707_v35, %v1707_v35  ;;  %v723_v2 = vadd.f32 %v1707_v35, %v1714_v38  ;;  %v771_v5 = vadd.f32 %v1707_v35, %v1721_v41 }
 0x271   :  { %v1692_v28 = vadd.f32 %v1612_v46, %v670_v26  ;;  %v694_v29 = vadd.f32 %v1685_v24, %v1685_v24  ;;  %v726_v30 = vadd.f32 %v1685_v24, %v1670_v15  ;;  %v774_v31 = vadd.f32 %v1685_v24, %v1659_v8  ;;  %v1711_v37 = vpop.eup %1283 }
 0x272   :  { %v822_v33 = vadd.f32 %v1685_v24, %v1648_v1  ;;  %1303 = vtanh.f32 %v772_v22  ;;  %v894_v36 = vadd.f32 %v1685_v24, %v1635_v58  ;;  %v1718_v40 = vpop.eup %1285  ;;  %v819_v6 = vadd.f32 %v1707_v35, %v1729_v45 }
 0x273   :  { %1305 = vtanh.f32 %v694_v29  ;;  %v693_v39 = vadd.f32 %v1692_v28, %v1692_v28  ;;  %v725_v42 = vadd.f32 %v1692_v28, %v1707_v35  ;;  %v773_v48 = vadd.f32 %v1692_v28, %v1714_v38 }
 0x274   :  { %1307 = vtanh.f32 %v726_v30  ;;  %v1725_v43 = vpop.eup %1287  ;;  %v821_v54 = vadd.f32 %v1692_v28, %v1721_v41  ;;  %v893_v56 = vadd.f32 %v1692_v28, %v1729_v45  ;;  %v891_v9 = vadd.f32 %v1707_v35, %v1759_v4 }
 0x275   :  { %1309 = vtanh.f32 %v774_v31  ;;  %v1733_v50 = vpop.eup %1289  ;;  %v721_v19 = vadd.f32 %v1714_v38, %v1721_v41  ;;  %v769_v22 = vadd.f32 %v1714_v38, %v1729_v45  ;;  %v817_v30 = vadd.f32 %v1714_v38, %v1759_v4 }
 0x276   :  { %1311 = vtanh.f32 %v822_v33  ;;  %v1737_v55 = vpop.eup %1291  ;;  %v889_v33 = vadd.f32 %v1714_v38, %v1618_v49 }
 0x277   :  { %1313 = vtanh.f32 %v894_v36 }
 0x278   :  { %1315 = vtanh.f32 %v693_v39  ;;  %v1741_v57 = vpop.eup %1293 }
 0x279   :  { %1317 = vtanh.f32 %v725_v42  ;;  %v1745_v60 = vpop.eup %1295 }
 0x27a   :  { %1319 = vtanh.f32 %v773_v48  ;;  %v1749_v62 = vpop.eup %1297  ;;  %v816_v48 = vadd.f32 %v1648_v1, %v1615_v47 }
 0x27b   :  { %1321 = vtanh.f32 %v821_v54 }
 0x27c   :  { %v1753_v0 = vpop.eup %1299  ;;  %1323 = vtanh.f32 %v893_v56 }
 0x27d   :  { %v1302_v3 = vpop.eup %1301  ;;  %1325 = vtanh.f32 %v820_v59  ;;  %v888_v59 = vadd.f32 %v1648_v1, %v1621_v51 }
 0x27e   :  { %1327 = vtanh.f32 %v892_v61 }
 0x27f   :  { %v1304_v7 = vpop.eup %1303  ;;  %1329 = vtanh.f32 %v691_v63 }
 0x280   :  { %v1306_v10 = vpop.eup %1305  ;;  %1331 = vtanh.f32 %v723_v2  ;;  %v804_v42 = vadd.f32 %v1304_v7, %v1302_v3  ;;  %v687_v2 = vadd.f32 %v1721_v41, %v1721_v41  ;;  %v1793_v3 = vadd.f32 %v1612_v46, %v1607_v44 }
 0x281   :  { %v1308_v53 = vpop.eup %1307  ;;  %1333 = vtanh.f32 %v771_v5  ;;  %v719_v7 = vadd.f32 %v1721_v41, %v1729_v45  ;;  %v815_v44 = vadd.f32 %v1721_v41, %v1618_v49 }
 0x282   :  { %v1310_v13 = vpop.eup %1309  ;;  %1335 = vtanh.f32 %v819_v6 }
 0x283   :  { %v1312_v16 = vpop.eup %1311  ;;  %v806_v18 = vadd.f32 %v1310_v13, %v1308_v53  ;;  %1337 = vtanh.f32 %v891_v9 }
 0x284   :  { %v1775_v21 = vpop.eup %1313  ;;  %1339 = vtanh.f32 %v818_v11 }
 0x285   :  { %v1316_v26 = vpop.eup %1315  ;;  %v854_v29 = vadd.f32 %v1312_v16, %v806_v18  ;;  %1341 = vtanh.f32 %v890_v12 }
 0x286   :  { %v1318_v31 = vpop.eup %1317  ;;  %1343 = vtanh.f32 %v689_v14  ;;  %v887_v14 = vadd.f32 %v1721_v41, %v1793_v3 }
 0x287   :  { %v1320_v36 = vpop.eup %1319  ;;  %v870_v39 = vmul.f32 2.0, %v854_v29  ;;  %1345 = vtanh.f32 %v721_v19  ;;  %v802_v19 = vadd.f32 %v1749_v62, %v1745_v60  ;;  %v717_v60 = vadd.f32 %v1729_v45, %v1759_v4 }
 0x288   :  { %v1322_v54 = vpop.eup %1321  ;;  %v805_v56 = vadd.f32 %v1320_v36, %v1318_v31  ;;  %1347 = vtanh.f32 %v769_v22  ;;  %v814_v22 = vadd.f32 %v1635_v58, %v1621_v51  ;;  %v765_v58 = vadd.f32 %v1729_v45, %v1618_v49 }
 0x289   :  { %v1787_v61 = vpop.eup %1323  ;;  %v886_v63 = vadd.f32 %v1306_v10, %v870_v39  ;;  %1349 = vtanh.f32 %v817_v30  ;;  %v767_v10 = vadd.f32 %v1721_v41, %v1759_v4 }
 0x28a   :  { %v1326_v5 = vpop.eup %1325  ;;  %v853_v6 = vadd.f32 %v1322_v54, %v805_v56  ;;  %1351 = vtanh.f32 %v889_v33  ;;  %v685_v33 = vadd.f32 %v1729_v45, %v1729_v45 }
 0x28b   :  { %v1797_v9 = vpop.eup %1327  ;;  %v918_v1 = vadd.f32 %v1775_v21, %v886_v63  ;;  %v852_v11 = vadd.f32 %v1326_v5, %v804_v42  ;;  %1353 = vtanh.f32 %v816_v48  ;;  %v813_v48 = vadd.f32 %v1729_v45, %v1793_v3 }
 0x28c   :  { %v1330_v53 = vpop.eup %1329  ;;  %v869_v12 = vmul.f32 2.0, %v853_v6  ;;  %1355 = vtanh.f32 %v888_v59  ;;  %v812_v59 = vadd.f32 %v1685_v24, %v1624_v52  ;;  %v683_v5 = vadd.f32 %v1759_v4, %v1759_v4 }
 0x28d   :  { %v1332_v46 = vpop.eup %1331  ;;  %1229 = vmatprep.subr.mxu1 %v918_v1  ;;  %v868_v13 = vmul.f32 2.0, %v852_v11  ;;  %1357 = vtanh.f32 %v687_v2  ;;  %v800_v45 = vadd.f32 %v1737_v55, %v1733_v50  ;;  %v811_v50 = vadd.f32 %v1692_v28, %v1759_v4 }
 0x28e   :  { %v1334_v16 = vpop.eup %1333  ;;  %1230 = vmatpush3.msra.mxu1 %v918_v1  ;;  %v885_v18 = vadd.f32 %v1316_v26, %v869_v12  ;;  %1359 = vtanh.f32 %v719_v7  ;;  %v715_v1 = vadd.f32 %v1759_v4, %v1618_v49  ;;  %v763_v12 = vadd.f32 %v1759_v4, %v1793_v3 }
 0x28f   :  { %v1336_v29 = vpop.eup %1335  ;;  %v884_v30 = vadd.f32 %v1753_v0, %v868_v13  ;;  %v803_v31 = vadd.f32 %v1334_v16, %v1332_v46  ;;  %1361 = vtanh.f32 %v767_v10  ;;  %v762_v13 = vadd.f32 %v1685_v24, %v1615_v47 }
 0x290   :  { %v1813_v36 = vpop.eup %1337  ;;  %v917_v41 = vadd.f32 %v1787_v61, %v885_v18  ;;  %1363 = vtanh.f32 %v815_v44  ;;  %v810_v18 = vadd.f32 %v1670_v15, %v1615_v47  ;;  %v713_v4 = vadd.f32 %v1618_v49, %v1793_v3 }
 0x291   :  { %v1340_v62 = vpop.eup %1339  ;;  %v851_v26 = vadd.f32 %v1336_v29, %v803_v31  ;;  %1365 = vtanh.f32 %v887_v14  ;;  %v916_v39 = vadd.f32 %v1797_v9, %v884_v30  ;;  %v761_v31 = vadd.f32 %v1692_v28, %v1618_v49 }
 0x292   :  { %v1820_v0 = vpop.eup %1341  ;;  %1231 = vmatprep.subr.mxu1 %v917_v41  ;;  %v850_v42 = vadd.f32 %v1340_v62, %v802_v19  ;;  %1367 = vtanh.f32 %v814_v22  ;;  %v798_v47 = vadd.f32 %v1718_v40, %v1711_v37  ;;  %v760_v37 = vadd.f32 %v1670_v15, %v1621_v51 }
 0x293   :  { %v1344_v54 = vpop.eup %1343  ;;  %1232 = vmatpush3.msra.mxu1 %v917_v41  ;;  %v867_v56 = vmul.f32 2.0, %v851_v26  ;;  %1369 = vtanh.f32 %v685_v33  ;;  %v759_v15 = vadd.f32 %v1707_v35, %v1793_v3 }
 0x294   :  { %v1346_v63 = vpop.eup %1345  ;;  %1233 = vmatprep.subr.mxu1 %v916_v39  ;;  %v866_v2 = vmul.f32 2.0, %v850_v42  ;;  %1371 = vtanh.f32 %v717_v60  ;;  %v809_v60 = vadd.f32 %v1707_v35, %v1618_v49  ;;  %v808_v49 = vadd.f32 %v1659_v8, %v1621_v51 }
 0x295   :  { %v1348_v6 = vpop.eup %1347  ;;  %1234 = vmatpush3.msra.mxu1 %v916_v39  ;;  %v883_v7 = vadd.f32 %v1330_v53, %v867_v56  ;;  %1373 = vtanh.f32 %v765_v58  ;;  %v712_v39 = vadd.f32 %v1685_v24, %v1621_v51  ;;  %v711_v24 = vadd.f32 %v1692_v28, %v1793_v3 }
 0x296   :  { %v1350_v11 = vpop.eup %1349  ;;  %v882_v52 = vadd.f32 %v1741_v57, %v866_v2  ;;  %v801_v10 = vadd.f32 %v1348_v6, %v1346_v63  ;;  %1375 = vtanh.f32 %v813_v48  ;;  %v796_v8 = vadd.f32 %v1700_v32, %v1689_v27 }
 0x297   :  { %v1836_v44 = vpop.eup %1351  ;;  %v915_v46 = vadd.f32 %v1813_v36, %v883_v7  ;;  %1377 = vtanh.f32 %v812_v59  ;;  %v807_v28 = vadd.f32 %v1714_v38, %v1793_v3  ;;  %v680_v35 = vadd.f32 %v1621_v51, %v1621_v51 }
 0x298   :  { %v1354_v55 = vpop.eup %1353  ;;  %v849_v53 = vadd.f32 %v1350_v11, %v801_v10  ;;  %1379 = vtanh.f32 %v683_v5  ;;  %v914_v14 = vadd.f32 %v1820_v0, %v882_v52 }
 0x299   :  { %v1843_v57 = vpop.eup %1355  ;;  %1235 = vmatprep.subr.mxu1 %v915_v46  ;;  %v848_v16 = vadd.f32 %v1354_v55, %v800_v45  ;;  %1381 = vtanh.f32 %v715_v1 }
 0x29a   :  { %v1358_v19 = vpop.eup %1357  ;;  %1236 = vmatpush3.msra.mxu1 %v915_v46  ;;  %v865_v22 = vmul.f32 2.0, %v849_v53  ;;  %1383 = vtanh.f32 %v763_v12 }
 0x29b   :  { %v1360_v29 = vpop.eup %1359  ;;  %1237 = vmatprep.subr.mxu1 %v914_v14  ;;  %v864_v30 = vmul.f32 2.0, %v848_v16  ;;  %1385 = vtanh.f32 %v811_v50  ;;  %v679_v50 = vadd.f32 %v1793_v3, %v1793_v3 }
 0x29c   :  { %v1362_v33 = vpop.eup %1361  ;;  %1238 = vmatpush3.msra.mxu1 %v914_v14  ;;  %v881_v41 = vadd.f32 %v1344_v54, %v865_v22  ;;  %1387 = vtanh.f32 %v762_v13 }
 0x29d   :  { %v1364_v62 = vpop.eup %1363  ;;  %v880_v26 = vadd.f32 %v1725_v43, %v864_v30  ;;  %v799_v58 = vadd.f32 %v1362_v33, %v1360_v29  ;;  %1389 = vtanh.f32 %v810_v18 }
 0x29e   :  { %v1859_v42 = vpop.eup %1365  ;;  %v913_v48 = vadd.f32 %v1836_v44, %v881_v41  ;;  %1391 = vtanh.f32 %v713_v4 }
 0x29f   :  { %v1368_v40 = vpop.eup %1367  ;;  %v847_v54 = vadd.f32 %v1364_v62, %v799_v58  ;;  %1393 = vtanh.f32 %v761_v31  ;;  %v912_v56 = vadd.f32 %v1843_v57, %v880_v26 }
 0x2a0   :  { %v1370_v43 = vpop.eup %1369  ;;  %1239 = vmatprep.subr.mxu1 %v913_v48  ;;  %v846_v59 = vadd.f32 %v1368_v40, %v798_v47  ;;  %1395 = vtanh.f32 %v809_v60 }
 0x2a1   :  { %v1372_v63 = vpop.eup %1371  ;;  %1240 = vmatpush3.msra.mxu1 %v913_v48  ;;  %v863_v2 = vmul.f32 2.0, %v847_v54  ;;  %1397 = vtanh.f32 %v712_v39 }
 0x2a2   :  { %v1374_v5 = vpop.eup %1373  ;;  %1241 = vmatprep.subr.mxu1 %v912_v56  ;;  %v862_v6 = vmul.f32 2.0, %v846_v59  ;;  %1399 = vtanh.f32 %v760_v37 }
 0x2a3   :  { %v1376_v7 = vpop.eup %1375  ;;  %1242 = vmatpush3.msra.mxu1 %v912_v56  ;;  %v879_v45 = vadd.f32 %v1358_v19, %v863_v2  ;;  %v797_v1 = vadd.f32 %v1374_v5, %v1372_v63  ;;  %1401 = vtanh.f32 %v808_v49 }
 0x2a4   :  { %v1378_v11 = vpop.eup %1377  ;;  %v878_v52 = vadd.f32 %v1704_v34, %v862_v6  ;;  %1403 = vtanh.f32 %v711_v24 }
 0x2a5   :  { %v1380_v10 = vpop.eup %1379  ;;  %v911_v12 = vadd.f32 %v1859_v42, %v879_v45  ;;  %v845_v27 = vadd.f32 %v1376_v7, %v797_v1  ;;  %v844_v32 = vadd.f32 %v1378_v11, %v796_v8  ;;  %1405 = vtanh.f32 %v759_v15  ;;  %v920_v8 = vld [vmem:[%s1907_s6 + $0x8] sm:$0xff] }
 0x2a6   :  { %v1382_v46 = vpop.eup %1381  ;;  %v910_v38 = vadd.f32 %v1775_v21, %v878_v52  ;;  %1407 = vtanh.f32 %v807_v28 }
 0x2a7   :  { %v1384_v55 = vpop.eup %1383  ;;  %1243 = vmatprep.subr.mxu1 %v911_v12  ;;  %v861_v53 = vmul.f32 2.0, %v845_v27  ;;  %v860_v34 = vmul.f32 2.0, %v844_v32  ;;  %1409 = vtanh.f32 %v680_v35 }
 0x2a8   :  { %v1386_v13 = vpop.eup %1385  ;;  %1244 = vmatpush3.msra.mxu1 %v911_v12  ;;  %v795_v51 = vadd.f32 %v1384_v55, %v1382_v46  ;;  %1411 = vtanh.f32 %v679_v50 }
 0x2a9   :  { %v1388_v14 = vpop.eup %1387  ;;  %1245 = vmatprep.subr.mxu1 %v910_v38  ;;  %v877_v16 = vadd.f32 %v1370_v43, %v861_v53  ;;  %v876_v18 = vadd.f32 %v1687_v25, %v860_v34 }
 0x2aa   :  { %v1390_v19 = vpop.eup %1389  ;;  %1246 = vmatpush3.msra.mxu1 %v910_v38  ;;  %v843_v22 = vadd.f32 %v1386_v13, %v795_v51  ;;  %v794_v3 = vadd.f32 %v1388_v14, %v1678_v20 }
 0x2ab   :  { %v1392_v4 = vpop.eup %1391  ;;  %v909_v21 = vadd.f32 %v1787_v61, %v877_v16  ;;  %v908_v41 = vadd.f32 %v1797_v9, %v876_v18 }
 0x2ac   :  { %v1394_v29 = vpop.eup %1393  ;;  %v859_v30 = vmul.f32 2.0, %v843_v22  ;;  %v842_v31 = vadd.f32 %v1390_v19, %v794_v3 }
 0x2ad   :  { %v1396_v33 = vpop.eup %1395  ;;  %1247 = vmatprep.subr.mxu1 %v909_v21  ;;  %v793_v47 = vadd.f32 %v1394_v29, %v1392_v4 }
 0x2ae   :  { %v1398_v60 = vpop.eup %1397  ;;  %1248 = vmatpush3.msra.mxu1 %v909_v21  ;;  %v875_v25 = vadd.f32 %v1380_v10, %v859_v30  ;;  %v858_v62 = vmul.f32 2.0, %v842_v31 }
 0x2af   :  { %v1400_v26 = vpop.eup %1399  ;;  %1249 = vmatprep.subr.mxu1 %v908_v41  ;;  %v841_v58 = vadd.f32 %v1396_v33, %v793_v47 }
 0x2b0   :  { %v1402_v20 = vpop.eup %1401  ;;  %1250 = vmatpush3.msra.mxu1 %v908_v41  ;;  %v907_v61 = vadd.f32 %v1813_v36, %v875_v25  ;;  %v874_v39 = vadd.f32 %v1672_v17, %v858_v62  ;;  %v792_v48 = vadd.f32 %v1400_v26, %v1398_v60 }
 0x2b1   :  { %v1404_v37 = vpop.eup %1403  ;;  %v857_v40 = vmul.f32 2.0, %v841_v58 }
 0x2b2   :  { %v1406_v54 = vpop.eup %1405  ;;  %1251 = vmatprep.subr.mxu1 %v907_v61  ;;  %v906_v9 = vadd.f32 %v1820_v0, %v874_v39  ;;  %v840_v49 = vadd.f32 %v1402_v20, %v792_v48 }
 0x2b3   :  { %1252 = vmatpush3.msra.mxu1 %v907_v61  ;;  %v873_v43 = vadd.f32 %v1682_v23, %v857_v40  ;;  %v791_v56 = vadd.f32 %v1406_v54, %v1404_v37  ;;  %v1408_v59 = vpop.eup %1407 }
 0x2b4   :  { %1253 = vmatprep.subr.mxu1 %v906_v9  ;;  %v856_v24 = vmul.f32 2.0, %v840_v49  ;;  %v1410_v63 = vpop.eup %1409 }
 0x2b5   :  { %1254 = vmatpush3.msra.mxu1 %v906_v9  ;;  %v905_v36 = vadd.f32 %v1836_v44, %v873_v43  ;;  %v839_v17 = vadd.f32 %v1408_v59, %v791_v56  ;;  %v1412_v5 = vpop.eup %1411 }
 0x2b6   :  { %v872_v2 = vadd.f32 %v1410_v63, %v856_v24 }
 0x2b7   :  { %1255 = vmatprep.subr.mxu1 %v905_v36  ;;  %v855_v15 = vmul.f32 2.0, %v839_v17 }
 0x2b8   :  { %1256 = vmatpush3.msra.mxu1 %v905_v36  ;;  %v904_v0 = vadd.f32 %v1843_v57, %v872_v2 }
 0x2b9   :  { %v871_v6 = vadd.f32 %v1412_v5, %v855_v15 }
 0x2ba   :  { %1257 = vmatprep.subr.mxu1 %v904_v0 }
 0x2bb   :  { %1258 = vmatpush3.msra.mxu1 %v904_v0  ;;  %v903_v23 = vadd.f32 %v1859_v42, %v871_v6 }
 0x2bd   :  { %1259 = vmatprep.subr.mxu1 %v903_v23 }
 0x2be   :  { %1260 = vmatpush3.msra.mxu1 %v903_v23 }
 0x2bf   :  { %1262 = vmatmul.mubr.f32.vlgmr.msra.gmra.mxu1 %v920_v8 }
 0x37f   :  { %v1263_v44 = vpop.f32.mrf.mxu1 }
 0x380   :  { %997 = vst.msk [vmem:[#allocation2 + $0x8] sm:$0xff] %vm265_vm1, %v1263_v44 }
 0x381   :  { %v987_v7 = vpop.f32.mrf.mxu1 }
 0x382   :  { %996 = vst.msk [vmem:[#allocation2] sm:$0xff] %vm265_vm1, %v987_v7 }
 0x383   :  { %1424 = shalt.err (!%p1421_p4)
}
 0x384   :  { %s1436_s6 = smov 128   ;;  %s1437_s1 = smov 8  }
 0x385   :  { %1009 = dma.vmem_to_hbm [thread:$0]  %s1004_s30, 256, %s1908_s7, [#allocation3], %s1436_s6, %s1436_s6, %s1437_s1  }
 0x386   :  { %1433 = dma.done.wait [#allocation3], 256  }
 0x387   :  { %1434 = vsyncadd [#allocation3], 4294967040 }
 0x388   :  { %1013 = vsyncpa [#allocation3], 1 }

</bundles_post_ra>
